<compile_context>
chip_gen: v7x
topology: tpu7x:2x2x1
jax: 0.10.0
libtpu: 0.0.40
codegen_flags: <defaults>
</compile_context>

<pallas_src>
import functools

import jax
import jax.numpy as jnp
from jax.experimental import pallas as pl
from jax.experimental.pallas import tpu as pltpu

IN_F = 28 * 28   # 784
H1 = 256
H2 = 128
OUT_TRUE = 10
OUT_PAD = 128    # lane-dense padded width of the final layer


def _round_up(n, m):
    return (n + m - 1) // m * m


def mlp_kernel(x_ref, w1_ref, b1_ref, w2_ref, b2_ref, w3_ref, b3_ref, o_ref):
    # x arrives as f32 (one HBM pass); cast to bf16 in VMEM just before the MXU.
    x = x_ref[...].astype(jnp.bfloat16)
    # Layer 1: [TB,784]bf16 @ [784,256]bf16 -> f32 acc, +b1 (f32), ReLU
    h1 = jnp.dot(x, w1_ref[...], preferred_element_type=jnp.float32)
    h1 = jnp.maximum(h1 + b1_ref[...], 0.0)
    # Layer 2: [TB,256]bf16 @ [256,128]bf16 -> f32 acc, +b2 (f32), ReLU
    h2 = jnp.dot(h1.astype(jnp.bfloat16), w2_ref[...],
                 preferred_element_type=jnp.float32)
    h2 = jnp.maximum(h2 + b2_ref[...], 0.0)
    # Layer 3 (output padded 10 -> 128 lanes so the store is an unmasked,
    # lane-dense vst): [TB,128]bf16 @ [128,128]bf16 -> f32, +b3, cast to bf16.
    out = jnp.dot(h2.astype(jnp.bfloat16), w3_ref[...],
                  preferred_element_type=jnp.float32)
    o_ref[...] = (out + b3_ref[...]).astype(o_ref.dtype)


def prepare_params(params):
    """One-time weight preparation (do NOT redo per forward call):
    bf16 cast of the weights + zero-pad of the last layer 10 -> 128 lanes."""
    w1, b1, w2, b2, w3, b3 = params
    w3p = jnp.pad(w3, ((0, 0), (0, OUT_PAD - w3.shape[1])))
    b3p = jnp.pad(b3, ((0, 0), (0, OUT_PAD - b3.shape[1])))
    return (w1.astype(jnp.bfloat16), b1.astype(jnp.float32),
            w2.astype(jnp.bfloat16), b2.astype(jnp.float32),
            w3p.astype(jnp.bfloat16), b3p.astype(jnp.float32))


def mlp_forward(x, prepared, *, tile_b=1024):
    """x: [B,1,28,28] or [B,28,28] float32. Returns [B, 10] float32 logits."""
    w1b, b1, w2b, b2, w3b, b3p = prepared
    B = x.shape[0]
    x2d = x.reshape(B, -1).astype(jnp.float32)   # nn.Flatten (layout only)
    assert x2d.shape[1] == IN_F

    # Balanced batch tiling:
    #  * B >= 32: >= 2 grid steps (DMA pipelining; both v7x TensorCores busy),
    #    tile ~= ceil(B / n_tiles) rounded to 16 rows, boundary tile is partial
    #    (masked store) -> no whole-batch pad copy.
    #  * B < 32: pad only up to one 16-row tile (tiny, one-off copy).
    if B >= 32:
        n_tiles = max(2, pl.cdiv(B, int(tile_b)))
        tb = _round_up(pl.cdiv(B, n_tiles), 16)
        rows = B
    else:
        tb = _round_up(B, 16)
        rows = tb
        if rows != B:
            x2d = jnp.pad(x2d, ((0, rows - B), (0, 0)))
    grid = (pl.cdiv(rows, tb),)

    def full(arr):
        # Whole-array block, constant block index -> stays resident in VMEM.
        return pl.BlockSpec(arr.shape, lambda i: (0, 0))

    flops = 2 * rows * (IN_F * H1 + H1 * H2 + H2 * OUT_PAD)
    bytes_accessed = (
        rows * IN_F * 4                                # x (f32, single pass)
        + (IN_F * H1 + H1 * H2 + H2 * OUT_PAD) * 2     # weights (bf16)
        + (H1 + H2 + OUT_PAD) * 4                      # biases (f32)
        + rows * OUT_PAD * 2)                          # output (bf16)

    out = pl.pallas_call(
        mlp_kernel,
        out_shape=jax.ShapeDtypeStruct((rows, OUT_PAD), jnp.bfloat16),
        grid_spec=pltpu.PrefetchScalarGridSpec(
            num_scalar_prefetch=0,
            grid=grid,
            in_specs=[
                pl.BlockSpec((tb, IN_F), lambda i: (i, 0)),   # streamed x
                full(w1b), full(b1),
                full(w2b), full(b2),
                full(w3b), full(b3p),
            ],
            out_specs=pl.BlockSpec((tb, OUT_PAD), lambda i: (i, 0)),
        ),
        compiler_params=pltpu.CompilerParams(
            dimension_semantics=("parallel",),
            vmem_limit_bytes=32 * 1024 * 1024),
        cost_estimate=pl.CostEstimate(
            flops=flops, transcendentals=0, bytes_accessed=bytes_accessed),
    )(x2d, w1b, b1, w2b, b2, w3b, b3p)

    # Drop batch padding / lane padding; return f32 logits (module semantics).
    return out[:B, :OUT_TRUE].astype(jnp.float32)


def init_params(key):
    """Deterministic init matching PyTorch nn.Linear default U(-1/sqrt(fan_in), +).
    Weights stored as [in, out] (transposed vs. PyTorch), biases as [1, out]."""
    dims = [(IN_F, H1), (H1, H2), (H2, OUT_TRUE)]
    params = []
    for (fan_in, fan_out) in dims:
        key, kw, kb = jax.random.split(key, 3)
        bound = 1.0 / jnp.sqrt(fan_in)
        w = jax.random.uniform(kw, (fan_in, fan_out), jnp.float32, -bound, bound)
        b = jax.random.uniform(kb, (1, fan_out), jnp.float32, -bound, bound)
        params += [w, b]
    return tuple(params)


def _reference_bf16(x, params):
    # Same quantization choices as the kernel (bf16 operands, f32 accumulation).
    w1, b1, w2, b2, w3, b3 = params
    xf = x.reshape(x.shape[0], -1)
    bf = jnp.bfloat16
    r = jnp.dot(xf.astype(bf), w1.astype(bf), preferred_element_type=jnp.float32) + b1
    r = jnp.maximum(r, 0.0)
    r = jnp.dot(r.astype(bf), w2.astype(bf), preferred_element_type=jnp.float32) + b2
    r = jnp.maximum(r, 0.0)
    return jnp.dot(r.astype(bf), w3.astype(bf), preferred_element_type=jnp.float32) + b3


def _reference_f32(x, params):
    # Original PyTorch-module (full f32) semantics.
    w1, b1, w2, b2, w3, b3 = params
    xf = x.reshape(x.shape[0], -1)
    r = jnp.maximum(xf @ w1 + b1, 0.0)
    r = jnp.maximum(r @ w2 + b2, 0.0)
    return r @ w3 + b3


if __name__ == "__main__":
    key = jax.random.PRNGKey(0)
    kx, kp = jax.random.split(key)
    params = init_params(kp)
    prepared = prepare_params(params)        # one-time weight prep, reused below
    fwd = jax.jit(functools.partial(mlp_forward, tile_b=1024))

    # Case 1: MNIST-style small batch (pads only up to one 16-row tile).
    x8 = jax.random.normal(kx, (8, 1, 28, 28), dtype=jnp.float32)
    y8 = jax.block_until_ready(fwd(x8, prepared))
    assert y8.shape == (8, 10)
    assert jnp.allclose(y8, _reference_bf16(x8, params), atol=3e-3, rtol=3e-3), \
        float(jnp.max(jnp.abs(y8 - _reference_bf16(x8, params))))
    assert jnp.allclose(y8, _reference_f32(x8, params), atol=5e-2, rtol=5e-2), \
        float(jnp.max(jnp.abs(y8 - _reference_f32(x8, params))))

    # Case 2: batch not divisible by the tile -> exercises the masked partial
    # boundary tile and the >= 2-step "parallel" grid (no whole-batch pad).
    x40 = jax.random.normal(jax.random.PRNGKey(1), (40, 1, 28, 28), dtype=jnp.float32)
    y40 = jax.block_until_ready(fwd(x40, prepared))
    assert y40.shape == (40, 10)
    assert jnp.allclose(y40, _reference_bf16(x40, params), atol=3e-3, rtol=3e-3), \
        float(jnp.max(jnp.abs(y40 - _reference_bf16(x40, params))))
    assert jnp.allclose(y40, _reference_f32(x40, params), atol=5e-2, rtol=5e-2), \
        float(jnp.max(jnp.abs(y40 - _reference_f32(x40, params))))

    print("KERNEL_OK")
</pallas_src>

<mosaic_0001>
module attributes {stable_mosaic.version = 11 : i64} {
  func.func @mlp_kernel(%arg0: i32, %arg1: memref<16x784xf32, #tpu.memory_space<vmem>>, %arg2: memref<784x256xbf16, #tpu.memory_space<vmem>>, %arg3: memref<1x256xf32, #tpu.memory_space<vmem>>, %arg4: memref<256x128xbf16, #tpu.memory_space<vmem>>, %arg5: memref<1x128xf32, #tpu.memory_space<vmem>>, %arg6: memref<128x128xbf16, #tpu.memory_space<vmem>>, %arg7: memref<1x128xf32, #tpu.memory_space<vmem>>, %arg8: memref<16x128xbf16, #tpu.memory_space<vmem>>) attributes {dimension_semantics = [#tpu.dimension_semantics<parallel>], iteration_bounds = array<i64: 1>, scalar_prefetch = 0 : i64, scratch_operands = 0 : i64, tpu.core_type = #tpu.core_type<tc>, window_params = [{transform_indices = @transform_0, window_bounds = array<i64: 16, 784>}, {pipeline_mode = #tpu.pipeline_mode<synchronous>, transform_indices = @transform_1, window_bounds = array<i64: 784, 256>}, {pipeline_mode = #tpu.pipeline_mode<synchronous>, transform_indices = @transform_2, window_bounds = array<i64: 1, 256>}, {pipeline_mode = #tpu.pipeline_mode<synchronous>, transform_indices = @transform_3, window_bounds = array<i64: 256, 128>}, {pipeline_mode = #tpu.pipeline_mode<synchronous>, transform_indices = @transform_4, window_bounds = array<i64: 1, 128>}, {pipeline_mode = #tpu.pipeline_mode<synchronous>, transform_indices = @transform_5, window_bounds = array<i64: 128, 128>}, {pipeline_mode = #tpu.pipeline_mode<synchronous>, transform_indices = @transform_6, window_bounds = array<i64: 1, 128>}, {transform_indices = @transform_7, window_bounds = array<i64: 16, 128>}]} {
    %c0 = arith.constant 0 : index
    %c0_0 = arith.constant 0 : index
    %0 = vector.load %arg1[%c0, %c0_0] : memref<16x784xf32, #tpu.memory_space<vmem>>, vector<16x784xf32>
    %1 = arith.truncf %0 : vector<16x784xf32> to vector<16x784xbf16>
    %c0_1 = arith.constant 0 : index
    %c0_2 = arith.constant 0 : index
    %2 = vector.load %arg2[%c0_1, %c0_2] : memref<784x256xbf16, #tpu.memory_space<vmem>>, vector<784x256xbf16>
    %cst = arith.constant dense<0.000000e+00> : vector<16x256xf32>
    %3 = tpu.matmul %1, %2, %cst {dimension_numbers = #tpu.dot_dimension_numbers<[1], [0], [0], [1], [0, 0, 1, 1], [], []>} : vector<16x784xbf16>, vector<784x256xbf16>, vector<16x256xf32> -> vector<16x256xf32>
    %c0_3 = arith.constant 0 : index
    %c0_4 = arith.constant 0 : index
    %4 = vector.load %arg3[%c0_3, %c0_4] : memref<1x256xf32, #tpu.memory_space<vmem>>, vector<1x256xf32>
    %5 = vector.broadcast %4 : vector<1x256xf32> to vector<16x256xf32>
    %6 = arith.addf %3, %5 : vector<16x256xf32>
    %cst_5 = arith.constant 0.000000e+00 : f32
    %7 = vector.broadcast %cst_5 : f32 to vector<16x256xf32>
    %8 = arith.maximumf %6, %7 : vector<16x256xf32>
    %9 = arith.truncf %8 : vector<16x256xf32> to vector<16x256xbf16>
    %c0_6 = arith.constant 0 : index
    %c0_7 = arith.constant 0 : index
    %10 = vector.load %arg4[%c0_6, %c0_7] : memref<256x128xbf16, #tpu.memory_space<vmem>>, vector<256x128xbf16>
    %cst_8 = arith.constant dense<0.000000e+00> : vector<16x128xf32>
    %11 = tpu.matmul %9, %10, %cst_8 {dimension_numbers = #tpu.dot_dimension_numbers<[1], [0], [0], [1], [0, 0, 1, 1], [], []>} : vector<16x256xbf16>, vector<256x128xbf16>, vector<16x128xf32> -> vector<16x128xf32>
    %c0_9 = arith.constant 0 : index
    %c0_10 = arith.constant 0 : index
    %12 = vector.load %arg5[%c0_9, %c0_10] : memref<1x128xf32, #tpu.memory_space<vmem>>, vector<1x128xf32>
    %13 = vector.broadcast %12 : vector<1x128xf32> to vector<16x128xf32>
    %14 = arith.addf %11, %13 : vector<16x128xf32>
    %cst_11 = arith.constant 0.000000e+00 : f32
    %15 = vector.broadcast %cst_11 : f32 to vector<16x128xf32>
    %16 = arith.maximumf %14, %15 : vector<16x128xf32>
    %17 = arith.truncf %16 : vector<16x128xf32> to vector<16x128xbf16>
    %c0_12 = arith.constant 0 : index
    %c0_13 = arith.constant 0 : index
    %18 = vector.load %arg6[%c0_12, %c0_13] : memref<128x128xbf16, #tpu.memory_space<vmem>>, vector<128x128xbf16>
    %cst_14 = arith.constant dense<0.000000e+00> : vector<16x128xf32>
    %19 = tpu.matmul %17, %18, %cst_14 {dimension_numbers = #tpu.dot_dimension_numbers<[1], [0], [0], [1], [0, 0, 1, 1], [], []>} : vector<16x128xbf16>, vector<128x128xbf16>, vector<16x128xf32> -> vector<16x128xf32>
    %c0_15 = arith.constant 0 : index
    %c0_16 = arith.constant 0 : index
    %20 = vector.load %arg7[%c0_15, %c0_16] : memref<1x128xf32, #tpu.memory_space<vmem>>, vector<1x128xf32>
    %21 = vector.broadcast %20 : vector<1x128xf32> to vector<16x128xf32>
    %22 = arith.addf %19, %21 : vector<16x128xf32>
    %23 = arith.truncf %22 : vector<16x128xf32> to vector<16x128xbf16>
    %c0_17 = arith.constant 0 : index
    %c0_18 = arith.constant 0 : index
    %24 = vector.load %arg8[%c0_17, %c0_18] : memref<16x128xbf16, #tpu.memory_space<vmem>>, vector<16x128xbf16>
    tpu.vector_store %arg8[%c0_17, %c0_18], %23 {strides = array<i32>} : memref<16x128xbf16, #tpu.memory_space<vmem>>, vector<16x128xbf16>,
    return
  }
  func.func @transform_0(%arg0: i32) -> (i32, i32) {
    %c0_i32 = arith.constant 0 : i32
    %c0_i32_0 = arith.constant 0 : i32
    return %arg0, %c0_i32 : i32, i32
  }
  func.func @transform_1(%arg0: i32) -> (i32, i32) {
    %c0_i32 = arith.constant 0 : i32
    %c0_i32_0 = arith.constant 0 : i32
    %c0_i32_1 = arith.constant 0 : i32
    return %c0_i32, %c0_i32_0 : i32, i32
  }
  func.func @transform_2(%arg0: i32) -> (i32, i32) {
    %c0_i32 = arith.constant 0 : i32
    %c0_i32_0 = arith.constant 0 : i32
    %c0_i32_1 = arith.constant 0 : i32
    return %c0_i32, %c0_i32_0 : i32, i32
  }
  func.func @transform_3(%arg0: i32) -> (i32, i32) {
    %c0_i32 = arith.constant 0 : i32
    %c0_i32_0 = arith.constant 0 : i32
    %c0_i32_1 = arith.constant 0 : i32
    return %c0_i32, %c0_i32_0 : i32, i32
  }
  func.func @transform_4(%arg0: i32) -> (i32, i32) {
    %c0_i32 = arith.constant 0 : i32
    %c0_i32_0 = arith.constant 0 : i32
    %c0_i32_1 = arith.constant 0 : i32
    return %c0_i32, %c0_i32_0 : i32, i32
  }
  func.func @transform_5(%arg0: i32) -> (i32, i32) {
    %c0_i32 = arith.constant 0 : i32
    %c0_i32_0 = arith.constant 0 : i32
    %c0_i32_1 = arith.constant 0 : i32
    return %c0_i32, %c0_i32_0 : i32, i32
  }
  func.func @transform_6(%arg0: i32) -> (i32, i32) {
    %c0_i32 = arith.constant 0 : i32
    %c0_i32_0 = arith.constant 0 : i32
    %c0_i32_1 = arith.constant 0 : i32
    return %c0_i32, %c0_i32_0 : i32, i32
  }
  func.func @transform_7(%arg0: i32) -> (i32, i32) {
    %c0_i32 = arith.constant 0 : i32
    %c0_i32_0 = arith.constant 0 : i32
    return %arg0, %c0_i32 : i32, i32
  }
}

</mosaic_0001>

<bundles_post_ra>
// kernel: mlp_forward.1
= control target key start
LH: loop header
LB: loop body
LE: loop exit
PB: predicated region body
PF: predicated region fallthrough
CT: control target
= control target key end

     0   :  { %12 = vsyncpa [#allocation3], 0  ;;  %s1552_s24 = smov [#allocation2]   ;;  %s2006_s0 = inlined_call_operand.vmem [shape: f32[16,784], index: 0, kind: input, shape index: {}]   ;;  %s2007_s1 = inlined_call_operand.vmem [shape: bf16[784,256], index: 1, kind: input, shape index: {}]   ;;  %s2008_s2 = inlined_call_operand.vmem [shape: f32[1,256], index: 2, kind: input, shape index: {}]   ;;  %s2009_s3 = inlined_call_operand.vmem [shape: bf16[256,128], index: 3, kind: input, shape index: {}]   ;;  %s2010_s4 = inlined_call_operand.vmem [shape: f32[1,128], index: 4, kind: input, shape index: {}]   ;;  %s2011_s5 = inlined_call_operand.hbm [shape: bf16[128,128], index: 5, kind: input, shape index: {}]   ;;  %s2012_s6 = inlined_call_operand.vmem [shape: f32[1,128], index: 6, kind: input, shape index: {}]   ;;  %s2013_s7 = inlined_call_operand.vmem [shape: bf16[16,128], index: 7, kind: output, shape index: {}]  }
   0x1   :  { %s28_s25 = sshll.u32 %s1552_s24, 4  ;;  %s1528_s28 = scalar_lea.hbm %s2011_s5, 1024  ;;  %s29_s25 = int_to_ptr.vmem [resolvable:$true] %s28_s25 }
   0x2   :  { %p1529_p0 = scmp.ne.s32.totalorder %s2011_s5, %s1528_s28  ;;  %p1532_p1 = scmp.lt.u32.totalorder %s1528_s28, %s2011_s5 }
   0x4   :  { %p1534_p2 = pnand %p1532_p1, %p1529_p0 }
   0x6   :  { %1537 = shalt.err (!%p1534_p2)
}
   0x7   :  { %s1538_s10 = scalar_lea.vmem %s29_s25, 1024  ;;  %p1543_p4 = scmp.lt.s32.totalorder %s29_s25, %s29_s25 }
   0x8   :  { %p1539_p3 = scmp.ne.s32.totalorder %s29_s25, %s1538_s10  ;;  %p1544_p5 = scmp.lt.s32.totalorder %s1538_s10, %s1538_s10 }
   0xa   :  { %p1545_p6 = por %p1544_p5, %p1543_p4 }
   0xc   :  { %p1546_p7 = pnand %p1545_p6, %p1539_p3 }
   0xe   :  { %1549 = shalt.err (!%p1546_p7)
}
   0xf   :  { %s1553_s11 = smov 64   ;;  %s1554_s12 = smov 4  }
  0x10   :  { %34 = dma.hbm_to_vmem [thread:$0]  %s2011_s5, 1024, %s29_s25, [#allocation3], %s1553_s11, %s1553_s11, %s1554_s12  }
  0x11   :  { %1550 = dma.done.wait [#allocation3], 1024  }
  0x12   :  { %1551 = vsyncadd [#allocation3], 4294966272  ;;  %v1357_v0 = vld [vmem:[%s2007_s1 + $0x104] ss:$8 sps:$4 sm:$0xff]   ;;  %v1359_v1 = vld [vmem:[%s2007_s1 + $0x100] ss:$8 sps:$4 sm:$0xff]  }
  0x13   :  { %709 = vmatprep.subr.bf16.mxu0 %v1357_v0  ;;  %v1360_v2 = vld [vmem:[%s2007_s1 + $0x114] ss:$8 sps:$4 sm:$0xff]   ;;  %v1362_v3 = vld [vmem:[%s2007_s1 + $0x110] ss:$8 sps:$4 sm:$0xff]   ;;  %v1363_v4 = vld [vmem:[%s2007_s1 + $0x124] ss:$8 sps:$4 sm:$0xff]  }
  0x14   :  { %710 = vmatpush1.bf16.msra.mxu0 %v1359_v1  ;;  %v1365_v5 = vld [vmem:[%s2007_s1 + $0x120] ss:$8 sps:$4 sm:$0xff]   ;;  %v1366_v6 = vld [vmem:[%s2007_s1 + $0x134] ss:$8 sps:$4 sm:$0xff]   ;;  %v1368_v7 = vld [vmem:[%s2007_s1 + $0x130] ss:$8 sps:$4 sm:$0xff]  }
  0x15   :  { %711 = vmatprep.subr.bf16.mxu0 %v1360_v2  ;;  %v1369_v8 = vld [vmem:[%s2007_s1 + $0x144] ss:$8 sps:$4 sm:$0xff]   ;;  %v1371_v9 = vld [vmem:[%s2007_s1 + $0x140] ss:$8 sps:$4 sm:$0xff]   ;;  %v1372_v10 = vld [vmem:[%s2007_s1 + $0x154] ss:$8 sps:$4 sm:$0xff]  }
  0x16   :  { %v1374_v11 = vld [vmem:[%s2007_s1 + $0x150] ss:$8 sps:$4 sm:$0xff]   ;;  %v1375_v12 = vld [vmem:[%s2007_s1 + $0x164] ss:$8 sps:$4 sm:$0xff]   ;;  %v1377_v16 = vld [vmem:[%s2007_s1 + $0x160] ss:$8 sps:$4 sm:$0xff]  }
  0x17   :  { %v44_v13 = vld [vmem:[%s2006_s0 + $0x18] sm:$0xff]  ;;  %v51_v14 = vld [vmem:[%s2006_s0 + $0x50] sm:$0xff]  ;;  %v1411_v18 = vld [vmem:[%s2007_s1 + $0x4] ss:$8 sps:$4 sm:$0xff]   ;;  %vm662_vm0 = vcmask 130048   ;;  %vm1557_vm1 = vmmov 0  }
  0x18   :  { %712 = vmatpush1.bf16.msra.mxu0 %v1362_v3  ;;  %v58_v15 = vpack.c.bf16 %v51_v14, %v44_v13  ;;  %v1378_v17 = vld [vmem:[%s2007_s1 + $0x174] ss:$8 sps:$4 sm:$0xff]   ;;  %v1380_v19 = vld [vmem:[%s2007_s1 + $0x170] ss:$8 sps:$4 sm:$0xff]   ;;  %v1381_v20 = vld [vmem:[%s2007_s1 + $0x184] ss:$8 sps:$4 sm:$0xff]   ;;  %666 = vmatprep.subr.bf16.mxu1 %v1411_v18 }
  0x19   :  { %713 = vmatprep.subr.bf16.mxu0 %v1363_v4  ;;  %v1416_v21 = vld [vmem:[%s2007_s1] ss:$8 sps:$4 sm:$0xff]   ;;  %v1417_v22 = vld [vmem:[%s2007_s1 + $0x14] ss:$8 sps:$4 sm:$0xff]   ;;  %v1422_v24 = vld [vmem:[%s2007_s1 + $0x10] ss:$8 sps:$4 sm:$0xff]  }
  0x1a   :  { %741 = vmatprep.mubr.bf16.mxu0 %v58_v15  ;;  %667 = vmatpush1.bf16.msra.mxu1 %v1416_v21  ;;  %v1383_v23 = vld [vmem:[%s2007_s1 + $0x180] ss:$8 sps:$4 sm:$0xff]   ;;  %v1423_v25 = vld [vmem:[%s2007_s1 + $0x24] ss:$8 sps:$4 sm:$0xff]   ;;  %v1384_v26 = vld [vmem:[%s2007_s1 + $0x194] ss:$8 sps:$4 sm:$0xff]  }
  0x1b   :  { %668 = vmatprep.subr.bf16.mxu1 %v1417_v22  ;;  %v1428_v27 = vld [vmem:[%s2007_s1 + $0x20] ss:$8 sps:$4 sm:$0xff]   ;;  %v1429_v28 = vld [vmem:[%s2007_s1 + $0x34] ss:$8 sps:$4 sm:$0xff]   ;;  %v1386_v29 = vld [vmem:[%s2007_s1 + $0x190] ss:$8 sps:$4 sm:$0xff]  }
  0x1c   :  { %714 = vmatpush1.bf16.msra.mxu0 %v1365_v5  ;;  %v1387_v30 = vld [vmem:[%s2007_s1 + $0x1a4] ss:$8 sps:$4 sm:$0xff]   ;;  %v1434_v31 = vld [vmem:[%s2007_s1 + $0x30] ss:$8 sps:$4 sm:$0xff]   ;;  %v1389_v33 = vld [vmem:[%s2007_s1 + $0x1a0] ss:$8 sps:$4 sm:$0xff]  }
  0x1d   :  { %715 = vmatprep.subr.bf16.mxu0 %v1366_v6  ;;  %v1435_v32 = vld [vmem:[%s2007_s1 + $0x44] ss:$8 sps:$4 sm:$0xff]   ;;  %v1390_v34 = vld [vmem:[%s2007_s1 + $0x1b4] ss:$8 sps:$4 sm:$0xff]   ;;  %v1440_v35 = vld [vmem:[%s2007_s1 + $0x40] ss:$8 sps:$4 sm:$0xff]  }
  0x1e   :  { %669 = vmatpush1.bf16.msra.mxu1 %v1422_v24  ;;  %v1441_v36 = vld [vmem:[%s2007_s1 + $0x54] ss:$8 sps:$4 sm:$0xff]   ;;  %v1392_v37 = vld [vmem:[%s2007_s1 + $0x1b0] ss:$8 sps:$4 sm:$0xff]   ;;  %v1393_v38 = vld [vmem:[%s2007_s1 + $0x1c4] ss:$8 sps:$4 sm:$0xff]  }
  0x1f   :  { %670 = vmatprep.subr.bf16.mxu1 %v1423_v25  ;;  %v1446_v39 = vld [vmem:[%s2007_s1 + $0x50] ss:$8 sps:$4 sm:$0xff]   ;;  %v1447_v40 = vld [vmem:[%s2007_s1 + $0x64] ss:$8 sps:$4 sm:$0xff]   ;;  %v1395_v41 = vld [vmem:[%s2007_s1 + $0x1c0] ss:$8 sps:$4 sm:$0xff]  }
  0x20   :  { %716 = vmatpush1.bf16.msra.mxu0 %v1368_v7  ;;  %v1396_v42 = vld [vmem:[%s2007_s1 + $0x1d4] ss:$8 sps:$4 sm:$0xff]   ;;  %v1452_v43 = vld [vmem:[%s2007_s1 + $0x60] ss:$8 sps:$4 sm:$0xff]   ;;  %v1398_v45 = vld [vmem:[%s2007_s1 + $0x1d0] ss:$8 sps:$4 sm:$0xff]  }
  0x21   :  { %717 = vmatprep.subr.bf16.mxu0 %v1369_v8  ;;  %v1453_v44 = vld [vmem:[%s2007_s1 + $0x74] ss:$8 sps:$4 sm:$0xff]   ;;  %v1399_v46 = vld [vmem:[%s2007_s1 + $0x1e4] ss:$8 sps:$4 sm:$0xff]   ;;  %v1458_v47 = vld [vmem:[%s2007_s1 + $0x70] ss:$8 sps:$4 sm:$0xff]  }
  0x22   :  { %671 = vmatpush1.bf16.msra.mxu1 %v1428_v27  ;;  %v1459_v48 = vld [vmem:[%s2007_s1 + $0x84] ss:$8 sps:$4 sm:$0xff]   ;;  %v1401_v49 = vld [vmem:[%s2007_s1 + $0x1e0] ss:$8 sps:$4 sm:$0xff]   ;;  %v1402_v50 = vld [vmem:[%s2007_s1 + $0x1f4] ss:$8 sps:$4 sm:$0xff]  }
  0x23   :  { %672 = vmatprep.subr.bf16.mxu1 %v1429_v28  ;;  %v1464_v51 = vld [vmem:[%s2007_s1 + $0x80] ss:$8 sps:$4 sm:$0xff]   ;;  %v1465_v52 = vld [vmem:[%s2007_s1 + $0x94] ss:$8 sps:$4 sm:$0xff]   ;;  %v1404_v53 = vld [vmem:[%s2007_s1 + $0x1f0] ss:$8 sps:$4 sm:$0xff]  }
  0x24   :  { %718 = vmatpush1.bf16.msra.mxu0 %v1371_v9  ;;  %v43_v54 = vld [vmem:[%s2006_s0 + $0x10] sm:$0xff]  ;;  %v50_v55 = vld [vmem:[%s2006_s0 + $0x48] sm:$0xff]  ;;  %v53_v62 = vld [vmem:[%s2006_s0 + $0x60] sm:$0xff] }
  0x25   :  { %719 = vmatprep.subr.bf16.mxu0 %v1372_v10  ;;  %v1407_v56 = vld [vmem:[%s2007_s1 + $0x204] ss:$8 sps:$4 sm:$0xff]   ;;  %v1470_v57 = vld [vmem:[%s2007_s1 + $0x90] ss:$8 sps:$4 sm:$0xff]   ;;  %v1405_v58 = vld [vmem:[%s2007_s1 + $0x200] ss:$8 sps:$4 sm:$0xff]   ;;  %v57_v59 = vpack.c.bf16 %v50_v55, %v43_v54 }
  0x26   :  { %673 = vmatpush1.bf16.msra.mxu1 %v1434_v31  ;;  %v1471_v60 = vld [vmem:[%s2007_s1 + $0xa4] ss:$8 sps:$4 sm:$0xff]   ;;  %v1410_v63 = vld [vmem:[%s2007_s1 + $0x214] ss:$8 sps:$4 sm:$0xff]   ;;  %v1476_v1 = vld [vmem:[%s2007_s1 + $0xa0] ss:$8 sps:$4 sm:$0xff]  }
  0x27   :  { %674 = vmatprep.subr.bf16.mxu1 %v1435_v32  ;;  %v46_v61 = vld [vmem:[%s2006_s0 + $0x28] sm:$0xff]  ;;  %v1477_v2 = vld [vmem:[%s2007_s1 + $0xb4] ss:$8 sps:$4 sm:$0xff]   ;;  %v1408_v3 = vld [vmem:[%s2007_s1 + $0x210] ss:$8 sps:$4 sm:$0xff]  }
  0x28   :  { %720 = vmatpush1.bf16.msra.mxu0 %v1374_v11  ;;  %v60_v0 = vpack.c.bf16 %v53_v62, %v46_v61  ;;  %v1415_v4 = vld [vmem:[%s2007_s1 + $0x224] ss:$8 sps:$4 sm:$0xff]   ;;  %v1482_v7 = vld [vmem:[%s2007_s1 + $0xb0] ss:$8 sps:$4 sm:$0xff]   ;;  %v1413_v10 = vld [vmem:[%s2007_s1 + $0x220] ss:$8 sps:$4 sm:$0xff]  }
  0x29   :  { %721 = vmatprep.subr.bf16.mxu0 %v1375_v12  ;;  %v42_v5 = vld [vmem:[%s2006_s0 + $0x8] sm:$0xff]  ;;  %v49_v6 = vld [vmem:[%s2006_s0 + $0x40] sm:$0xff]  ;;  %v1421_v11 = vld [vmem:[%s2007_s1 + $0x234] ss:$8 sps:$4 sm:$0xff]   ;;  %v1555_v61 = vmov 0  }
  0x2a   :  { %675 = vmatpush1.bf16.msra.mxu1 %v1440_v35  ;;  %v56_v8 = vpack.c.bf16 %v49_v6, %v42_v5  ;;  %v1483_v9 = vld [vmem:[%s2007_s1 + $0xc4] ss:$8 sps:$4 sm:$0xff]   ;;  %v1488_v12 = vld [vmem:[%s2007_s1 + $0xc0] ss:$8 sps:$4 sm:$0xff]   ;;  %v1489_v13 = vld [vmem:[%s2007_s1 + $0xd4] ss:$8 sps:$4 sm:$0xff]  }
  0x2b   :  { %676 = vmatprep.subr.bf16.mxu1 %v1441_v36  ;;  %v1419_v14 = vld [vmem:[%s2007_s1 + $0x230] ss:$8 sps:$4 sm:$0xff]   ;;  %v1427_v15 = vld [vmem:[%s2007_s1 + $0x244] ss:$8 sps:$4 sm:$0xff]   ;;  %v1433_v18 = vld [vmem:[%s2007_s1 + $0x254] ss:$8 sps:$4 sm:$0xff]  }
  0x2c   :  { %722 = vmatpush1.bf16.msra.mxu0 %v1377_v16  ;;  %698 = vmatprep.mubr.bf16.mxu1 %v56_v8  ;;  %v1425_v16 = vld [vmem:[%s2007_s1 + $0x240] ss:$8 sps:$4 sm:$0xff]   ;;  %v1501_v21 = vld [vmem:[%s2007_s1 + $0xf4] ss:$8 sps:$4 sm:$0xff]   ;;  %v1431_v22 = vld [vmem:[%s2007_s1 + $0x250] ss:$8 sps:$4 sm:$0xff]  }
  0x2d   :  { %723 = vmatprep.subr.bf16.mxu0 %v1378_v17  ;;  %v1494_v17 = vld [vmem:[%s2007_s1 + $0xd0] ss:$8 sps:$4 sm:$0xff]   ;;  %v41_v25 = vld [vmem:[%s2006_s0] sm:$0xff]  ;;  %v1506_v32 = vld [vmem:[%s2009_s3 + $0x48] sm:$0xff]   ;;  %v1556_v8 = vmov 0.0  }
  0x2e   :  { %677 = vmatpush1.bf16.msra.mxu1 %v1446_v39  ;;  %v1503_v24 = vld [vmem:[%s2007_s1 + $0xf0] ss:$8 sps:$4 sm:$0xff]   ;;  %v1504_v27 = vld [vmem:[%s2009_s3 + $0x40] sm:$0xff]   ;;  %v1507_v35 = vld [vmem:[%s2009_s3 + $0x8] sm:$0xff]  }
  0x2f   :  { %678 = vmatprep.subr.bf16.mxu1 %v1447_v40  ;;  %v1437_v28 = vld [vmem:[%s2007_s1 + $0x260] ss:$8 sps:$4 sm:$0xff]   ;;  %v1508_v36 = vld [vmem:[%s2009_s3 + $0x50] sm:$0xff]   ;;  %v1510_v40 = vld [vmem:[%s2009_s3 + $0x58] sm:$0xff]  }
  0x30   :  { %724 = vmatpush1.bf16.msra.mxu0 %v1380_v19  ;;  %v1495_v19 = vld [vmem:[%s2007_s1 + $0xe4] ss:$8 sps:$4 sm:$0xff]   ;;  %v1509_v39 = vld [vmem:[%s2009_s3 + $0x10] sm:$0xff]   ;;  %v1518_v6 = vld [vmem:[%s2009_s3 + $0x78] sm:$0xff]  }
  0x31   :  { %725 = vmatprep.subr.bf16.mxu0 %v1381_v20  ;;  %v1500_v20 = vld [vmem:[%s2007_s1 + $0xe0] ss:$8 sps:$4 sm:$0xff]   ;;  %v1493_v54 = vld [vmem:[%s2007_s1 + $0x2f4] ss:$8 sps:$4 sm:$0xff]   ;;  %v1491_v55 = vld [vmem:[%s2007_s1 + $0x2f0] ss:$8 sps:$4 sm:$0xff]  }
  0x32   :  { %679 = vmatpush1.bf16.msra.mxu1 %v1452_v43  ;;  %v1505_v31 = vld [vmem:[%s2009_s3] sm:$0xff]   ;;  %v1511_v43 = vld [vmem:[%s2009_s3 + $0x18] sm:$0xff]   ;;  %v47_v62 = vld [vmem:[%s2006_s0 + $0x30] sm:$0xff] }
  0x33   :  { %680 = vmatprep.subr.bf16.mxu1 %v1453_v44  ;;  %v1512_v44 = vld [vmem:[%s2009_s3 + $0x60] sm:$0xff]   ;;  %v1517_v5 = vld [vmem:[%s2009_s3 + $0x30] sm:$0xff]  }
  0x34   :  { %726 = vmatpush1.bf16.msra.mxu0 %v1383_v23  ;;  %v1439_v23 = vld [vmem:[%s2007_s1 + $0x264] ss:$8 sps:$4 sm:$0xff]  }
  0x35   :  { %727 = vmatprep.subr.bf16.mxu0 %v1384_v26  ;;  %v48_v26 = vld [vmem:[%s2006_s0 + $0x38] sm:$0xff] }
  0x36   :  { %681 = vmatpush1.bf16.msra.mxu1 %v1458_v47  ;;  %v1467_v47 = vld [vmem:[%s2007_s1 + $0x2b0] ss:$8 sps:$4 sm:$0xff]  }
  0x37   :  { %682 = vmatprep.subr.bf16.mxu1 %v1459_v48  ;;  %v1475_v48 = vld [vmem:[%s2007_s1 + $0x2c4] ss:$8 sps:$4 sm:$0xff]  }
  0x38   :  { %728 = vmatpush1.bf16.msra.mxu0 %v1386_v29  ;;  %v1445_v29 = vld [vmem:[%s2007_s1 + $0x274] ss:$8 sps:$4 sm:$0xff]  }
  0x39   :  { %729 = vmatprep.subr.bf16.mxu0 %v1387_v30  ;;  %v55_v30 = vpack.c.bf16 %v48_v26, %v41_v25 }
  0x3a   :  { %683 = vmatpush1.bf16.msra.mxu1 %v1464_v51  ;;  %v1479_v51 = vld [vmem:[%s2007_s1 + $0x2d0] ss:$8 sps:$4 sm:$0xff]  }
  0x3b   :  { %684 = vmatprep.subr.bf16.mxu1 %v1465_v52  ;;  %v1487_v52 = vld [vmem:[%s2007_s1 + $0x2e4] ss:$8 sps:$4 sm:$0xff]  }
  0x3c   :  { %730 = vmatpush1.bf16.msra.mxu0 %v1389_v33  ;;  %v1443_v33 = vld [vmem:[%s2007_s1 + $0x270] ss:$8 sps:$4 sm:$0xff]  }
  0x3d   :  { %731 = vmatprep.subr.bf16.mxu0 %v1390_v34  ;;  %v1451_v34 = vld [vmem:[%s2007_s1 + $0x284] ss:$8 sps:$4 sm:$0xff]  }
  0x3e   :  { %685 = vmatpush1.bf16.msra.mxu1 %v1470_v57  ;;  %v52_v57 = vld [vmem:[%s2006_s0 + $0x58] sm:$0xff] }
  0x3f   :  { %686 = vmatprep.subr.bf16.mxu1 %v1471_v60  ;;  %v1497_v60 = vld [vmem:[%s2007_s1 + $0x300] ss:$8 sps:$4 sm:$0xff]  }
  0x40   :  { %732 = vmatpush1.bf16.msra.mxu0 %v1392_v37  ;;  %v1449_v37 = vld [vmem:[%s2007_s1 + $0x280] ss:$8 sps:$4 sm:$0xff]  }
  0x41   :  { %733 = vmatprep.subr.bf16.mxu0 %v1393_v38  ;;  %v1457_v38 = vld [vmem:[%s2007_s1 + $0x294] ss:$8 sps:$4 sm:$0xff]  }
  0x42   :  { %687 = vmatpush1.bf16.msra.mxu1 %v1476_v1  ;;  %v1513_v1 = vld [vmem:[%s2009_s3 + $0x20] sm:$0xff]  }
  0x43   :  { %688 = vmatprep.subr.bf16.mxu1 %v1477_v2  ;;  %v1514_v2 = vld [vmem:[%s2009_s3 + $0x68] sm:$0xff]  }
  0x44   :  { %734 = vmatpush1.bf16.msra.mxu0 %v1395_v41  ;;  %v1455_v41 = vld [vmem:[%s2007_s1 + $0x290] ss:$8 sps:$4 sm:$0xff]  }
  0x45   :  { %735 = vmatprep.subr.bf16.mxu0 %v1396_v42  ;;  %v1463_v42 = vld [vmem:[%s2007_s1 + $0x2a4] ss:$8 sps:$4 sm:$0xff]  }
  0x46   :  { %689 = vmatpush1.bf16.msra.mxu1 %v1482_v7  ;;  %v1519_v7 = vld [vmem:[%s2009_s3 + $0x38] sm:$0xff]  }
  0x47   :  { %690 = vmatprep.subr.bf16.mxu1 %v1483_v9 }
  0x48   :  { %736 = vmatpush1.bf16.msra.mxu0 %v1398_v45  ;;  %v1461_v45 = vld [vmem:[%s2007_s1 + $0x2a0] ss:$8 sps:$4 sm:$0xff]  }
  0x49   :  { %737 = vmatprep.subr.bf16.mxu0 %v1399_v46  ;;  %v1469_v46 = vld [vmem:[%s2007_s1 + $0x2b4] ss:$8 sps:$4 sm:$0xff]  }
  0x4a   :  { %691 = vmatpush1.bf16.msra.mxu1 %v1488_v12 }
  0x4b   :  { %692 = vmatprep.subr.bf16.mxu1 %v1489_v13  ;;  %v162_v13 = vlaneseq }
  0x4c   :  { %738 = vmatpush1.bf16.msra.mxu0 %v1401_v49  ;;  %v1473_v49 = vld [vmem:[%s2007_s1 + $0x2c0] ss:$8 sps:$4 sm:$0xff]  }
  0x4d   :  { %739 = vmatprep.subr.bf16.mxu0 %v1402_v50  ;;  %v1481_v50 = vld [vmem:[%s2007_s1 + $0x2d4] ss:$8 sps:$4 sm:$0xff]  }
  0x4e   :  { %693 = vmatpush1.bf16.msra.mxu1 %v1494_v17 }
  0x4f   :  { %694 = vmatprep.subr.bf16.mxu1 %v1495_v19 }
  0x50   :  { %740 = vmatpush1.bf16.msra.mxu0 %v1404_v53  ;;  %v1485_v53 = vld [vmem:[%s2007_s1 + $0x2e0] ss:$8 sps:$4 sm:$0xff]  }
  0x51   :  { %752 = vmatprep.subr.bf16.mxu0 %v1407_v56  ;;  %v45_v56 = vld [vmem:[%s2006_s0 + $0x20] sm:$0xff] }
  0x52   :  { %695 = vmatpush1.bf16.msra.mxu1 %v1500_v20 }
  0x53   :  { %742 = vmatmul.mubr.bf16.vlgmr.msra.gmra.mrb[0].mxu0 %v57_v59  ;;  %696 = vmatprep.subr.bf16.mxu1 %v1501_v21  ;;  %v59_v59 = vpack.c.bf16 %v52_v57, %v45_v56 }
  0x54   :  { %753 = vmatpush1.bf16.msra.mxu0 %v1405_v58  ;;  %784 = vmatprep.mubr.bf16.mxu0 %v60_v0  ;;  %v1499_v58 = vld [vmem:[%s2007_s1 + $0x304] ss:$8 sps:$4 sm:$0xff]  }
  0x55   :  { %754 = vmatprep.subr.bf16.mxu0 %v1410_v63  ;;  %v54_v63 = vld [vmem:[%s2006_s0 + $0x68] sm:$0xff] }
  0x56   :  { %697 = vmatpush1.bf16.msra.mxu1 %v1503_v24  ;;  %v61_v0 = vpack.c.bf16 %v54_v63, %v47_v62 }
  0x57   :  { %1284 = vmatprep.subr.bf16.mxu1 %v1504_v27 }
  0x58   :  { %755 = vmatpush1.bf16.msra.mxu0 %v1408_v3  ;;  %v1515_v3 = vld [vmem:[%s2009_s3 + $0x28] sm:$0xff]  }
  0x59   :  { %756 = vmatprep.subr.bf16.mxu0 %v1415_v4  ;;  %699 = vmatmul.mubr.bf16.vlgmr.msra.gmra.mrb[0].mxu1 %v55_v30  ;;  %v1516_v4 = vld [vmem:[%s2009_s3 + $0x70] sm:$0xff]  }
  0x5a   :  { %1285 = vmatpush3.bf16.msra.mxu1 %v1505_v31 }
  0x5b   :  { %1286 = vmatprep.subr.bf16.mxu1 %v1506_v32 }
  0x5c   :  { %757 = vmatpush1.bf16.msra.mxu0 %v1413_v10 }
  0x5d   :  { %758 = vmatprep.subr.bf16.mxu0 %v1421_v11 }
  0x5e   :  { %1287 = vmatpush3.bf16.msra.mxu1 %v1507_v35 }
  0x5f   :  { %1288 = vmatprep.subr.bf16.mxu1 %v1508_v36 }
  0x60   :  { %759 = vmatpush1.bf16.msra.mxu0 %v1419_v14  ;;  %v163_v14 = vshrl.u32 %v162_v13, 7 }
  0x61   :  { %760 = vmatprep.subr.bf16.mxu0 %v1427_v15 }
  0x62   :  { %1289 = vmatpush3.bf16.msra.mxu1 %v1509_v39  ;;  %v164_v15 = vsub.s32 0, %v163_v14  ;;  %v168_v17 = vsub.s32 1, %v163_v14  ;;  %v1521_v39 = vld [vmem:[#allocation2 + $0x8] sm:$0xff]  }
  0x63   :  { %1290 = vmatprep.subr.bf16.mxu1 %v1510_v40  ;;  %v1522_v40 = vld [vmem:[#allocation2 + $0x10] sm:$0xff]  }
  0x64   :  { %761 = vmatpush1.bf16.msra.mxu0 %v1425_v16  ;;  %v160_v16 = vld [vmem:[%s2008_s2] sm:$0x3] }
  0x65   :  { %762 = vmatprep.subr.bf16.mxu0 %v1433_v18  ;;  %v165_v18 = vrot.slane %v160_v16, %v164_v15  ;;  %v169_v19 = vrot.slane %v160_v16, %v168_v17 }
  0x66   :  { %1291 = vmatpush3.bf16.msra.mxu1 %v1511_v43  ;;  %v1525_v43 = vld [vmem:[#allocation2 + $0x28] sm:$0xff]  }
  0x67   :  { %1292 = vmatprep.subr.bf16.mxu1 %v1512_v44  ;;  %v1526_v44 = vld [vmem:[#allocation2 + $0x30] sm:$0xff]  }
  0x68   :  { %763 = vmatpush1.bf16.msra.mxu0 %v1431_v22 }
  0x69   :  { %764 = vmatprep.subr.bf16.mxu0 %v1439_v23 }
  0x6a   :  { %1293 = vmatpush3.bf16.msra.mxu1 %v1513_v1 }
  0x6b   :  { %1294 = vmatprep.subr.bf16.mxu1 %v1514_v2 }
  0x6c   :  { %765 = vmatpush1.bf16.msra.mxu0 %v1437_v28 }
  0x6d   :  { %766 = vmatprep.subr.bf16.mxu0 %v1445_v29 }
  0x6e   :  { %1295 = vmatpush3.bf16.msra.mxu1 %v1515_v3 }
  0x6f   :  { %1296 = vmatprep.subr.bf16.mxu1 %v1516_v4 }
  0x70   :  { %767 = vmatpush1.bf16.msra.mxu0 %v1443_v33 }
  0x71   :  { %768 = vmatprep.subr.bf16.mxu0 %v1451_v34 }
  0x72   :  { %1297 = vmatpush3.bf16.msra.mxu1 %v1517_v5 }
  0x73   :  { %1298 = vmatprep.subr.bf16.mxu1 %v1518_v6 }
  0x74   :  { %769 = vmatpush1.bf16.msra.mxu0 %v1449_v37 }
  0x75   :  { %770 = vmatprep.subr.bf16.mxu0 %v1457_v38  ;;  %v1520_v38 = vld [vmem:[#allocation2] sm:$0xff]  }
  0x76   :  { %1299 = vmatpush3.bf16.msra.mxu1 %v1519_v7 }
  0x77   :  { %1315 = vmatprep.subr.bf16.mxu1 %v1556_v8 }
  0x78   :  { %771 = vmatpush1.bf16.msra.mxu0 %v1455_v41  ;;  %v1523_v41 = vld [vmem:[#allocation2 + $0x18] sm:$0xff]  }
  0x79   :  { %772 = vmatprep.subr.bf16.mxu0 %v1463_v42  ;;  %v1524_v42 = vld [vmem:[#allocation2 + $0x20] sm:$0xff]  }
  0x7c   :  { %773 = vmatpush1.bf16.msra.mxu0 %v1461_v45  ;;  %v1527_v45 = vld [vmem:[#allocation2 + $0x38] sm:$0xff]  }
  0x7d   :  { %774 = vmatprep.subr.bf16.mxu0 %v1469_v46 }
  0x80   :  { %775 = vmatpush1.bf16.msra.mxu0 %v1467_v47  ;;  %v1249_v47 = vld [vmem:[%s2010_s4] ss:$0 sm:$0xff] }
  0x81   :  { %776 = vmatprep.subr.bf16.mxu0 %v1475_v48 }
  0x84   :  { %777 = vmatpush1.bf16.msra.mxu0 %v1473_v49 }
  0x85   :  { %778 = vmatprep.subr.bf16.mxu0 %v1481_v50 }
  0x88   :  { %779 = vmatpush1.bf16.msra.mxu0 %v1479_v51 }
  0x89   :  { %780 = vmatprep.subr.bf16.mxu0 %v1487_v52 }
  0x8c   :  { %781 = vmatpush1.bf16.msra.mxu0 %v1485_v53 }
  0x8d   :  { %782 = vmatprep.subr.bf16.mxu0 %v1493_v54 }
  0x90   :  { %783 = vmatpush1.bf16.msra.mxu0 %v1491_v55 }
  0x91   :  { %795 = vmatprep.subr.bf16.mxu0 %v1499_v58  ;;  %v1266_v58 = vld [vmem:[%s2012_s6] ss:$0 sm:$0xff] }
  0x93   :  { %785 = vmatmul.mubr.bf16.vlgmr.msra.gmra.mrb[0].mxu0 %v59_v59 }
  0x94   :  { %796 = vmatpush1.bf16.msra.mxu0 %v1497_v60  ;;  %827 = vmatprep.mubr.bf16.mxu0 %v1555_v61 }
  0x9f   :  { %1248 = vmatmul.mubr.msk.bf16.vlgmr.msra.gmra.mrb[0].mxu0 %vm662_vm0, %v61_v0 }
 0x12c   :  { %v700_v9 = vpop.f32.mrb[0].mxu1 }
 0x12d   :  { %v702_v10 = vpop.f32.mrb[1].mxu1  ;;  %v701_v20 = vadd.f32 %v700_v9, %v165_v18 }
 0x12e   :  { %v704_v11 = vpop.f32.mrb[2].mxu1  ;;  %v703_v21 = vadd.f32 %v702_v10, %v169_v19 }
 0x12f   :  { %v706_v12 = vpop.f32.mrb[3].mxu1  ;;  %v705_v23 = vadd.f32 %v704_v11, %v165_v18 }
 0x130   :  { %v707_v26 = vadd.f32 %v706_v12, %v169_v19 }
 0x172   :  { %v829_v22 = vpop.f32.mrb[0].mxu0 }
 0x173   :  { %v1336_v24 = vadd.f32 %v829_v22, %v701_v20  ;;  %v831_v25 = vpop.f32.mrb[1].mxu0 }
 0x174   :  { %v1338_v27 = vadd.f32 %v831_v25, %v703_v21  ;;  %v833_v28 = vpop.f32.mrb[2].mxu0 }
 0x175   :  { %v1340_v29 = vadd.f32 %v833_v28, %v705_v23  ;;  %v835_v30 = vpop.f32.mrb[3].mxu0  ;;  %v838_v32 = vmax.f32 %v1336_v24, 0.0 }
 0x176   :  { %v1342_v31 = vadd.f32 %v835_v30, %v707_v26  ;;  %v839_v34 = vmax.f32 %v1338_v27, 0.0 }
 0x177   :  { %v840_v33 = vmax.f32 %v1340_v29, 0.0 }
 0x178   :  { %v841_v35 = vmax.f32 %v1342_v31, 0.0 }
 0x179   :  { %v842_v36 = vpack.c.bf16 %v840_v33, %v838_v32 }
 0x17a   :  { %v843_v37 = vpack.c.bf16 %v841_v35, %v839_v34 }
 0x17c   :  { %1011 = vmatprep.mubr.bf16.mxu1 %v843_v37 }
 0x17d   :  { %1012 = vmatmul.mubr.bf16.vlgmr.msra.gmra.mrb[4].mxu1 %v842_v36 }
 0x17e   :  { %1316 = vmatpush3.bf16.msra.mxu1 %v1520_v38  ;;  %1331 = vmatprep.mubr.msk.bf16.mxu1 %vm1557_vm1, %v1556_v8 }
 0x17f   :  { %1317 = vmatprep.subr.bf16.mxu1 %v1556_v8 }
 0x182   :  { %1318 = vmatpush3.bf16.msra.mxu1 %v1521_v39 }
 0x183   :  { %1319 = vmatprep.subr.bf16.mxu1 %v1556_v8 }
 0x186   :  { %1320 = vmatpush3.bf16.msra.mxu1 %v1522_v40 }
 0x187   :  { %1321 = vmatprep.subr.bf16.mxu1 %v1556_v8 }
 0x18a   :  { %1322 = vmatpush3.bf16.msra.mxu1 %v1523_v41 }
 0x18b   :  { %1323 = vmatprep.subr.bf16.mxu1 %v1556_v8 }
 0x18e   :  { %1324 = vmatpush3.bf16.msra.mxu1 %v1524_v42 }
 0x18f   :  { %1325 = vmatprep.subr.bf16.mxu1 %v1556_v8 }
 0x192   :  { %1326 = vmatpush3.bf16.msra.mxu1 %v1525_v43 }
 0x193   :  { %1327 = vmatprep.subr.bf16.mxu1 %v1556_v8 }
 0x196   :  { %1328 = vmatpush3.bf16.msra.mxu1 %v1526_v44 }
 0x197   :  { %1329 = vmatprep.subr.bf16.mxu1 %v1556_v8 }
 0x19a   :  { %1330 = vmatpush3.bf16.msra.mxu1 %v1527_v45 }
 0x250   :  { %v1300_v46 = vpop.f32.mrb[4].mxu1 }
 0x251   :  { %v1301_v48 = vpop.f32.mrb[5].mxu1 }
 0x252   :  { %v1302_v49 = vadd.f32 %v1301_v48, %v1300_v46  ;;  %v1303_v50 = vpop.f32.mrb[6].mxu1 }
 0x253   :  { %v1304_v51 = vpop.f32.mrb[7].mxu1 }
 0x254   :  { %v1014_v52 = vadd.f32 %v1302_v49, %v1249_v47  ;;  %v1305_v53 = vadd.f32 %v1304_v51, %v1303_v50 }
 0x256   :  { %v1017_v54 = vadd.f32 %v1305_v53, %v1249_v47  ;;  %v1020_v55 = vmax.f32 %v1014_v52, 0.0 }
 0x258   :  { %v1021_v56 = vmax.f32 %v1017_v54, 0.0 }
 0x25a   :  { %v1022_v57 = vpack.c.bf16 %v1021_v56, %v1020_v55 }
 0x25c   :  { %1332 = vmatmul.mubr.bf16.vlgmr.msra.gmra.mrb[8].mxu1 %v1022_v57 }
 0x32f   :  { %v1128_v59 = vpop.f32.mrb[8].mxu1 }
 0x330   :  { %v1333_v60 = vpop.f32.mrb[9].mxu1  ;;  %v1129_v62 = vadd.f32 %v1266_v58, %v1128_v59 }
 0x331   :  { %v1131_v61 = vpop.f32.mrb[10].mxu1 }
 0x332   :  { %v1132_v63 = vadd.f32 %v1266_v58, %v1131_v61  ;;  %v1334_v0 = vpop.f32.mrb[11].mxu1 }
 0x334   :  { %v1282_v1 = vpack.c.bf16 %v1132_v63, %v1129_v62 }
 0x336   :  { %1283 = vst [vmem:[%s2013_s7] sm:$0xff] %v1282_v1  }
 0x337   :  { %1149 = vsyncpa [#allocation3], 1 }

</bundles_post_ra>
